<compile_context>
chip_gen: v7x
topology: tpu7x:2x2x1
jax: 0.10.0
libtpu: 0.0.40
codegen_flags: <defaults>
</compile_context>

<pallas_src>
import functools

import jax
import jax.numpy as jnp
from jax.experimental import pallas as pl
from jax.experimental.pallas import tpu as pltpu


def _round_up(x, m):
    return ((x + m - 1) // m) * m


def _device_kind():
    try:
        return jax.devices()[0].device_kind.lower()
    except Exception:  # pragma: no cover - CPU/interpret fallbacks
        return ""


def _is_v5e():
    k = _device_kind()
    return ("v5 lite" in k) or ("v5lite" in k) or ("v5e" in k)


def _has_bf16_vpu():
    # bf16 VPU/EUP exists on v6e and newer; older parts are f32-only.
    k = _device_kind()
    return ("v6" in k) or ("v7" in k)


def _self_attention_kernel(face_ref, pose_ref, wk_wt_ref, wk_b_ref,
                           wt_ref, b_ref, wd_ref, out_ref, *, act_dtype):
    mxu_dtype = wk_wt_ref.dtype

    face = face_ref[...]                               # (TB, F)
    pose = pose_ref[...]                               # (TB, F)
    wk_wt = wk_wt_ref[...]                             # (F, K)  pre-transposed WK.weight
    wk_b = wk_b_ref[...]                               # (1, K)  f32
    w_t = wt_ref[...]                                  # (K, I)  pre-transposed W
    b = b_ref[...]                                     # (1, I)  f32
    wd = wd_ref[...]                                   # (1, I)  f32

    def energy(x):
        # Two tiny MXU passes; accumulate in f32.
        k = jnp.dot(x.astype(mxu_dtype), wk_wt,
                    preferred_element_type=jnp.float32) + wk_b       # (TB, K)
        pre = jnp.dot(k.astype(mxu_dtype), w_t,
                      preferred_element_type=jnp.float32) + b        # (TB, I)
        # tanh on the EUP (bf16 on v6e/v7x); WD reduce on the VPU/XLU instead
        # of an N=1 matmul.
        h = jnp.tanh(pre.astype(act_dtype)).astype(jnp.float32)
        return jnp.sum(h * wd, axis=-1, keepdims=True)               # (TB, 1)

    e_face = energy(face)
    e_pose = energy(pose)

    # Numerically-stable 2-way softmax over {face, pose}.
    m = jnp.maximum(e_face, e_pose)
    ef = jnp.exp(e_face - m)
    ep = jnp.exp(e_pose - m)
    inv = 1.0 / (ef + ep)                              # exact; denom in (1, 2]

    face_f = face.astype(jnp.float32)
    pose_f = pose.astype(jnp.float32)
    out = face_f * (ef * inv) + pose_f * (ep * inv)
    out_ref[...] = out.astype(out_ref.dtype)


def prepare_params(wk_w, wk_b, w, b, wd, *, mxu_dtype=None):
    """One-time weight layout plumbing (hoisted out of the per-call path).

    wk_w: (K, F) WK.weight, wk_b: (K,), w: (I, K), b: (I,), wd: (I,).
    mxu_dtype=None -> bf16 on v5e (no native f32 MXU path), f32 elsewhere.
    """
    if mxu_dtype is None:
        mxu_dtype = jnp.bfloat16 if _is_v5e() else jnp.float32
    wk_wt = wk_w.T.astype(mxu_dtype)                   # (F, K)
    wk_b2 = wk_b.astype(jnp.float32).reshape(1, -1)    # (1, K)
    w_t = w.T.astype(mxu_dtype)                        # (K, I)
    b2 = b.astype(jnp.float32).reshape(1, -1)          # (1, I)
    wd2 = wd.astype(jnp.float32).reshape(1, -1)        # (1, I)
    return (wk_wt, wk_b2, w_t, b2, wd2)


def self_attention(face, pose, params, *, act_dtype=None, tile_b=None):
    """face/pose: (B, F) streamed; params from prepare_params() stay resident."""
    wk_wt, wk_b2, w_t, b2, wd2 = params
    B, F = face.shape
    K = wk_wt.shape[1]
    I = w_t.shape[1]

    if act_dtype is None:
        act_dtype = jnp.bfloat16 if _has_bf16_vpu() else jnp.float32

    # Batch tile: big enough to amortize the ~0.35 us/grid-step overhead
    # (8192 x 32 x 4 B = 1 MiB per stream buffer; 3 streams x 2 buffers = 6 MiB,
    # far under every generation's VMEM), capped at ceil(B/2) rounded to 8 so
    # the "parallel" batch axis keeps >= 2 steps for v7x's two TensorCores.
    if tile_b is None:
        tile_b = 8192
    tile_b = max(8, min(int(tile_b), _round_up(pl.cdiv(B, 2), 8)))

    grid = (pl.cdiv(B, tile_b),)

    # Last dim of the block equals the full array dim (F) -> legal even for
    # F < 128; the (tile_b, F) HBM region is contiguous, so DMA stays dense.
    data_spec = pl.BlockSpec((tile_b, F), lambda i: (i, 0))

    def const_spec(a):
        # Full-array block with a constant index -> DMA'd once, stays resident.
        return pl.BlockSpec(a.shape, lambda i: (0, 0))

    bytes_w = sum(int(p.size) * p.dtype.itemsize for p in params)
    cost = pl.CostEstimate(
        flops=int(4 * B * (F * K + K * I) + 6 * B * F + 4 * B * I),
        transcendentals=int(2 * B * I + 2 * B),
        bytes_accessed=int(3 * B * F * face.dtype.itemsize + bytes_w),
    )

    kernel = functools.partial(_self_attention_kernel, act_dtype=act_dtype)

    return pl.pallas_call(
        kernel,
        out_shape=jax.ShapeDtypeStruct((B, F), face.dtype),
        grid=grid,
        in_specs=[
            data_spec, data_spec,
            const_spec(wk_wt), const_spec(wk_b2),
            const_spec(w_t), const_spec(b2), const_spec(wd2),
        ],
        out_specs=data_spec,
        compiler_params=pltpu.CompilerParams(
            dimension_semantics=("parallel",),
            vmem_limit_bytes=32 * 1024 * 1024,
        ),
        cost_estimate=cost,
    )(face, pose, wk_wt, wk_b2, w_t, b2, wd2)


def reference(face, pose, wk_w, wk_b, w, b, wd):
    k_face = face @ wk_w.T + wk_b
    k_pose = pose @ wk_w.T + wk_b
    e_face = jnp.tanh(k_face @ w.T + b) @ wd           # (B,)
    e_pose = jnp.tanh(k_pose @ w.T + b) @ wd           # (B,)
    e = jax.nn.softmax(jnp.stack([e_face, e_pose], axis=1), axis=1)
    return face * e[:, 0:1] + pose * e[:, 1:2]


if __name__ == "__main__":
    # Small shapes consistent with the module's forward.
    B, dim_feature, dim_k, dim_inner = 8, 32, 16, 24

    key = jax.random.PRNGKey(0)
    k_face, k_pose, k_wkw, k_wkb, k_wd, k_w, k_b = jax.random.split(key, 7)

    face = jax.random.normal(k_face, (B, dim_feature), jnp.float32)
    pose = jax.random.normal(k_pose, (B, dim_feature), jnp.float32)

    # nn.Linear(dim_feature, dim_k): weight (dim_k, dim_feature), bias (dim_k,)
    lim = 1.0 / jnp.sqrt(jnp.float32(dim_feature))
    wk_w = jax.random.uniform(k_wkw, (dim_k, dim_feature), jnp.float32, -lim, lim)
    wk_b = jax.random.uniform(k_wkb, (dim_k,), jnp.float32, -lim, lim)

    # WD = (rand(dim_inner) - 0.5) * 2 * sqrt(1/dim_feature)
    wd = ((jax.random.uniform(k_wd, (dim_inner,), jnp.float32) - 0.5)
          * 2.0 * jnp.sqrt(jnp.float32(1.0 / dim_feature)))
    # W = (rand(dim_inner, dim_k) - 0.5) * 2 * sqrt(1/dim_k)
    w = ((jax.random.uniform(k_w, (dim_inner, dim_k), jnp.float32) - 0.5)
         * 2.0 * jnp.sqrt(jnp.float32(1.0 / dim_k)))
    # b = randn(dim_inner)
    b = jax.random.normal(k_b, (dim_inner,), jnp.float32)

    ref = reference(face, pose, wk_w, wk_b, w, b, wd)

    # 1) Strict f32 path: matches the torch module's f32 semantics.
    params_f32 = prepare_params(wk_w, wk_b, w, b, wd, mxu_dtype=jnp.float32)
    out = jax.block_until_ready(
        self_attention(face, pose, params_f32, act_dtype=jnp.float32))
    assert out.shape == (B, dim_feature)
    assert jnp.allclose(out, ref, atol=1e-4, rtol=1e-4)

    # 2) Generation-tuned default path (bf16 tanh on v6e/v7x, bf16 MXU on v5e);
    #    looser tolerance only reflects the reduced-precision compute.
    params_auto = prepare_params(wk_w, wk_b, w, b, wd)
    out_auto = jax.block_until_ready(self_attention(face, pose, params_auto))
    assert jnp.allclose(out_auto, ref, atol=5e-2, rtol=5e-2)

    # 3) Larger batch that exercises the ragged last block and the multi-step
    #    (2-TensorCore-shardable) grid without any host-side padding.
    B2 = 300
    k_f2, k_p2 = jax.random.split(jax.random.PRNGKey(1), 2)
    face2 = jax.random.normal(k_f2, (B2, dim_feature), jnp.float32)
    pose2 = jax.random.normal(k_p2, (B2, dim_feature), jnp.float32)
    out2 = jax.block_until_ready(
        self_attention(face2, pose2, params_f32, act_dtype=jnp.float32))
    ref2 = reference(face2, pose2, wk_w, wk_b, w, b, wd)
    assert out2.shape == (B2, dim_feature)
    assert jnp.allclose(out2, ref2, atol=1e-4, rtol=1e-4)

    print("KERNEL_OK")
</pallas_src>

<mosaic_0001>
module attributes {stable_mosaic.version = 11 : i64} {
  func.func @_self_attention_kernel(%arg0: i32, %arg1: memref<8x32xf32, #tpu.memory_space<vmem>>, %arg2: memref<8x32xf32, #tpu.memory_space<vmem>>, %arg3: memref<32x16xf32, #tpu.memory_space<vmem>>, %arg4: memref<1x16xf32, #tpu.memory_space<vmem>>, %arg5: memref<16x24xf32, #tpu.memory_space<vmem>>, %arg6: memref<1x24xf32, #tpu.memory_space<vmem>>, %arg7: memref<1x24xf32, #tpu.memory_space<vmem>>, %arg8: memref<8x32xf32, #tpu.memory_space<vmem>>) attributes {dimension_semantics = [#tpu.dimension_semantics<parallel>], iteration_bounds = array<i64: 1>, scalar_prefetch = 0 : i64, scratch_operands = 0 : i64, tpu.core_type = #tpu.core_type<tc>, window_params = [{transform_indices = @transform_0, window_bounds = array<i64: 8, 32>}, {transform_indices = @transform_1, window_bounds = array<i64: 8, 32>}, {pipeline_mode = #tpu.pipeline_mode<synchronous>, transform_indices = @transform_2, window_bounds = array<i64: 32, 16>}, {pipeline_mode = #tpu.pipeline_mode<synchronous>, transform_indices = @transform_3, window_bounds = array<i64: 1, 16>}, {pipeline_mode = #tpu.pipeline_mode<synchronous>, transform_indices = @transform_4, window_bounds = array<i64: 16, 24>}, {pipeline_mode = #tpu.pipeline_mode<synchronous>, transform_indices = @transform_5, window_bounds = array<i64: 1, 24>}, {pipeline_mode = #tpu.pipeline_mode<synchronous>, transform_indices = @transform_6, window_bounds = array<i64: 1, 24>}, {transform_indices = @transform_7, window_bounds = array<i64: 8, 32>}]} {
    %c0 = arith.constant 0 : index
    %c0_0 = arith.constant 0 : index
    %0 = vector.load %arg1[%c0, %c0_0] : memref<8x32xf32, #tpu.memory_space<vmem>>, vector<8x32xf32>
    %c0_1 = arith.constant 0 : index
    %c0_2 = arith.constant 0 : index
    %1 = vector.load %arg2[%c0_1, %c0_2] : memref<8x32xf32, #tpu.memory_space<vmem>>, vector<8x32xf32>
    %c0_3 = arith.constant 0 : index
    %c0_4 = arith.constant 0 : index
    %2 = vector.load %arg3[%c0_3, %c0_4] : memref<32x16xf32, #tpu.memory_space<vmem>>, vector<32x16xf32>
    %c0_5 = arith.constant 0 : index
    %c0_6 = arith.constant 0 : index
    %3 = vector.load %arg4[%c0_5, %c0_6] : memref<1x16xf32, #tpu.memory_space<vmem>>, vector<1x16xf32>
    %c0_7 = arith.constant 0 : index
    %c0_8 = arith.constant 0 : index
    %4 = vector.load %arg5[%c0_7, %c0_8] : memref<16x24xf32, #tpu.memory_space<vmem>>, vector<16x24xf32>
    %c0_9 = arith.constant 0 : index
    %c0_10 = arith.constant 0 : index
    %5 = vector.load %arg6[%c0_9, %c0_10] : memref<1x24xf32, #tpu.memory_space<vmem>>, vector<1x24xf32>
    %c0_11 = arith.constant 0 : index
    %c0_12 = arith.constant 0 : index
    %6 = vector.load %arg7[%c0_11, %c0_12] : memref<1x24xf32, #tpu.memory_space<vmem>>, vector<1x24xf32>
    %cst = arith.constant dense<0.000000e+00> : vector<8x16xf32>
    %7 = tpu.matmul %0, %2, %cst {dimension_numbers = #tpu.dot_dimension_numbers<[1], [0], [0], [1], [0, 0, 1, 1], [], []>} : vector<8x32xf32>, vector<32x16xf32>, vector<8x16xf32> -> vector<8x16xf32>
    %8 = vector.broadcast %3 : vector<1x16xf32> to vector<8x16xf32>
    %9 = arith.addf %7, %8 : vector<8x16xf32>
    %cst_13 = arith.constant dense<0.000000e+00> : vector<8x24xf32>
    %10 = tpu.matmul %9, %4, %cst_13 {dimension_numbers = #tpu.dot_dimension_numbers<[1], [0], [0], [1], [0, 0, 1, 1], [], []>} : vector<8x16xf32>, vector<16x24xf32>, vector<8x24xf32> -> vector<8x24xf32>
    %11 = vector.broadcast %5 : vector<1x24xf32> to vector<8x24xf32>
    %12 = arith.addf %10, %11 : vector<8x24xf32>
    %13 = math.tanh %12 : vector<8x24xf32>
    %14 = vector.broadcast %6 : vector<1x24xf32> to vector<8x24xf32>
    %15 = arith.mulf %13, %14 : vector<8x24xf32>
    %cst_14 = arith.constant dense<0.000000e+00> : vector<8xf32>
    %16 = vector.multi_reduction <add>, %15, %cst_14 [1] : vector<8x24xf32> to vector<8xf32>
    %17 = vector.shape_cast %16 : vector<8xf32> to vector<8x1xf32>
    %cst_15 = arith.constant dense<0.000000e+00> : vector<8x16xf32>
    %18 = tpu.matmul %1, %2, %cst_15 {dimension_numbers = #tpu.dot_dimension_numbers<[1], [0], [0], [1], [0, 0, 1, 1], [], []>} : vector<8x32xf32>, vector<32x16xf32>, vector<8x16xf32> -> vector<8x16xf32>
    %19 = vector.broadcast %3 : vector<1x16xf32> to vector<8x16xf32>
    %20 = arith.addf %18, %19 : vector<8x16xf32>
    %cst_16 = arith.constant dense<0.000000e+00> : vector<8x24xf32>
    %21 = tpu.matmul %20, %4, %cst_16 {dimension_numbers = #tpu.dot_dimension_numbers<[1], [0], [0], [1], [0, 0, 1, 1], [], []>} : vector<8x16xf32>, vector<16x24xf32>, vector<8x24xf32> -> vector<8x24xf32>
    %22 = vector.broadcast %5 : vector<1x24xf32> to vector<8x24xf32>
    %23 = arith.addf %21, %22 : vector<8x24xf32>
    %24 = math.tanh %23 : vector<8x24xf32>
    %25 = vector.broadcast %6 : vector<1x24xf32> to vector<8x24xf32>
    %26 = arith.mulf %24, %25 : vector<8x24xf32>
    %cst_17 = arith.constant dense<0.000000e+00> : vector<8xf32>
    %27 = vector.multi_reduction <add>, %26, %cst_17 [1] : vector<8x24xf32> to vector<8xf32>
    %28 = vector.shape_cast %27 : vector<8xf32> to vector<8x1xf32>
    %29 = arith.maximumf %17, %28 : vector<8x1xf32>
    %30 = arith.subf %17, %29 : vector<8x1xf32>
    %31 = math.exp %30 : vector<8x1xf32>
    %32 = arith.subf %28, %29 : vector<8x1xf32>
    %33 = math.exp %32 : vector<8x1xf32>
    %34 = arith.addf %31, %33 : vector<8x1xf32>
    %cst_18 = arith.constant 1.000000e+00 : f32
    %35 = vector.broadcast %cst_18 : f32 to vector<8x1xf32>
    %36 = arith.divf %35, %34 : vector<8x1xf32>
    %37 = arith.mulf %31, %36 : vector<8x1xf32>
    %38 = vector.broadcast %37 : vector<8x1xf32> to vector<8x32xf32>
    %39 = arith.mulf %0, %38 : vector<8x32xf32>
    %40 = arith.mulf %33, %36 : vector<8x1xf32>
    %41 = vector.broadcast %40 : vector<8x1xf32> to vector<8x32xf32>
    %42 = arith.mulf %1, %41 : vector<8x32xf32>
    %43 = arith.addf %39, %42 : vector<8x32xf32>
    %c0_19 = arith.constant 0 : index
    %c0_20 = arith.constant 0 : index
    %44 = vector.load %arg8[%c0_19, %c0_20] : memref<8x32xf32, #tpu.memory_space<vmem>>, vector<8x32xf32>
    tpu.vector_store %arg8[%c0_19, %c0_20], %43 {strides = array<i32>} : memref<8x32xf32, #tpu.memory_space<vmem>>, vector<8x32xf32>,
    return
  }
  func.func @transform_0(%arg0: i32) -> (i32, i32) {
    %c0_i32 = arith.constant 0 : i32
    %c0_i32_0 = arith.constant 0 : i32
    return %arg0, %c0_i32 : i32, i32
  }
  func.func @transform_1(%arg0: i32) -> (i32, i32) {
    %c0_i32 = arith.constant 0 : i32
    %c0_i32_0 = arith.constant 0 : i32
    return %arg0, %c0_i32 : i32, i32
  }
  func.func @transform_2(%arg0: i32) -> (i32, i32) {
    %c0_i32 = arith.constant 0 : i32
    %c0_i32_0 = arith.constant 0 : i32
    %c0_i32_1 = arith.constant 0 : i32
    return %c0_i32, %c0_i32_0 : i32, i32
  }
  func.func @transform_3(%arg0: i32) -> (i32, i32) {
    %c0_i32 = arith.constant 0 : i32
    %c0_i32_0 = arith.constant 0 : i32
    %c0_i32_1 = arith.constant 0 : i32
    return %c0_i32, %c0_i32_0 : i32, i32
  }
  func.func @transform_4(%arg0: i32) -> (i32, i32) {
    %c0_i32 = arith.constant 0 : i32
    %c0_i32_0 = arith.constant 0 : i32
    %c0_i32_1 = arith.constant 0 : i32
    return %c0_i32, %c0_i32_0 : i32, i32
  }
  func.func @transform_5(%arg0: i32) -> (i32, i32) {
    %c0_i32 = arith.constant 0 : i32
    %c0_i32_0 = arith.constant 0 : i32
    %c0_i32_1 = arith.constant 0 : i32
    return %c0_i32, %c0_i32_0 : i32, i32
  }
  func.func @transform_6(%arg0: i32) -> (i32, i32) {
    %c0_i32 = arith.constant 0 : i32
    %c0_i32_0 = arith.constant 0 : i32
    %c0_i32_1 = arith.constant 0 : i32
    return %c0_i32, %c0_i32_0 : i32, i32
  }
  func.func @transform_7(%arg0: i32) -> (i32, i32) {
    %c0_i32 = arith.constant 0 : i32
    %c0_i32_0 = arith.constant 0 : i32
    return %arg0, %c0_i32 : i32, i32
  }
}

</mosaic_0001>

<bundles_post_ra>
// kernel: tpu_custom_call.1
= control target key start
LH: loop header
LB: loop body
LE: loop exit
PB: predicated region body
PF: predicated region fallthrough
CT: control target
= control target key end

     0   :  { %v506_v3 = vmov 0.0|0.0   ;;  %vm507_vm0 = vmmov 0   ;;  %v508_v6 = vmov 0.0   ;;  %s604_s0 = inlined_call_operand.vmem [shape: f32[8,32], index: 0, kind: input, shape index: {}]   ;;  %s605_s1 = inlined_call_operand.vmem [shape: f32[8,32], index: 1, kind: input, shape index: {}]   ;;  %s606_s2 = inlined_call_operand.vmem [shape: f32[32,16], index: 2, kind: input, shape index: {}]   ;;  %s607_s3 = inlined_call_operand.vmem [shape: f32[1,16], index: 3, kind: input, shape index: {}]   ;;  %s608_s4 = inlined_call_operand.vmem [shape: f32[16,24], index: 4, kind: input, shape index: {}]   ;;  %s609_s5 = inlined_call_operand.vmem [shape: f32[1,24], index: 5, kind: input, shape index: {}]   ;;  %s610_s6 = inlined_call_operand.vmem [shape: f32[1,24], index: 6, kind: input, shape index: {}]   ;;  %s611_s7 = inlined_call_operand.hbm [shape: f32[8,32], index: 7, kind: output, shape index: {}]  }
   0x1   :  { %v29_v0 = vld [vmem:[%s606_s2] sm:$0xff]  ;;  %v30_v1 = vld [vmem:[%s606_s2 + $0x8] sm:$0xff]  ;;  %v31_v2 = vld [vmem:[%s606_s2 + $0x10] sm:$0xff]  ;;  %450 = vmatprep.subr.bf16.mxu0 %v506_v3  ;;  %422 = vmatprep.mubr.msk.f32.mxu0 %vm507_vm0, %v508_v6 }
   0x2   :  { %v451_v4 = vpack.c.bf16 %v30_v1, %v29_v0  ;;  %v32_v5 = vld [vmem:[%s606_s2 + $0x18] sm:$0xff]  ;;  %v34_v7 = vld [vmem:[%s608_s4] sm:$0xff]  ;;  %456 = vmatprep.subr.bf16.mxu1 %v506_v3  ;;  %v35_v8 = vld [vmem:[%s608_s4 + $0x8] sm:$0xff]  ;;  %429 = vmatprep.mubr.msk.f32.mxu1 %vm507_vm0, %v508_v6 }
   0x3   :  { %12 = vsyncpa [#allocation3], 0  ;;  %v454_v9 = vpack.c.bf16 %v32_v5, %v31_v2  ;;  %v457_v10 = vpack.c.bf16 %v35_v8, %v34_v7  ;;  %v27_v11 = vld [vmem:[%s604_s0] sm:$0xff]  ;;  %vm44_vm1 = vcmask 261120   ;;  %vm124_vm2 = vcmask 130048  }
   0x4   :  { %452 = vmatpush3.bf16.msra.mxu0 %v451_v4  ;;  %v391_v12 = vld [vmem:[%s607_s3] ss:$0 sm:$0xff]  ;;  %vm206_vm3 = vcmask 195584  }
   0x5   :  { %453 = vmatprep.subr.bf16.mxu0 %v506_v3  ;;  %458 = vmatpush3.bf16.msra.mxu1 %v457_v10  ;;  %v28_v16 = vld [vmem:[%s605_s1] sm:$0xff]  ;;  %s509_s1 = smov [#allocation2]  }
   0x6   :  { %459 = vmatprep.subr.bf16.mxu1 %v506_v3  ;;  %v393_v17 = vld [vmem:[%s609_s5] ss:$0 sm:$0xff]  ;;  %s383_s5 = sshll.u32 %s509_s1, 4  ;;  %s384_s5 = int_to_ptr.vmem [resolvable:$true] %s383_s5 }
   0x7   :  { %v395_v24 = vld [vmem:[%s610_s6] ss:$0 sm:$0xff]  ;;  %s482_s6 = scalar_lea.vmem %s384_s5, 128  ;;  %p487_p1 = scmp.lt.s32.totalorder %s384_s5, %s384_s5 }
   0x8   :  { %455 = vmatpush3.bf16.msra.mxu0 %v454_v9  ;;  %p483_p0 = scmp.ne.s32.totalorder %s384_s5, %s482_s6  ;;  %p488_p2 = scmp.lt.s32.totalorder %s482_s6, %s482_s6 }
   0x9   :  { %465 = vmatprep.subr.bf16.mxu0 %v506_v3 }
   0xa   :  { %p489_p3 = por %p488_p2, %p487_p1 }
   0xb   :  { %423 = vmatmul.mubr.msk.f32.vlgmr.msra.gmra.mrb[0].mxu0 %vm44_vm1, %v27_v11 }
   0xc   :  { %467 = vmatpush3.bf16.msra.mxu0 %v457_v10  ;;  %447 = vmatprep.mubr.msk.f32.mxu0 %vm507_vm0, %v508_v6  ;;  %p490_p4 = pnand %p489_p3, %p483_p0 }
  0xde   :  { %v114_v13 = vpop.f32.mrb[0].mxu0 }
  0xdf   :  { %v115_v14 = vadd.f32 %v391_v12, %v114_v13  ;;  %v424_v15 = vpop.f32.mrb[1].mxu0 }
  0xe1   :  { %430 = vmatmul.mubr.msk.f32.vlgmr.msra.gmra.mrb[0].mxu1 %vm124_vm2, %v115_v14 }
  0xe2   :  { %461 = vmatpush3.bf16.msra.mxu1 %v451_v4  ;;  %440 = vmatprep.mubr.msk.f32.mxu1 %vm507_vm0, %v508_v6 }
  0xe3   :  { %462 = vmatprep.subr.bf16.mxu1 %v506_v3 }
  0xe6   :  { %464 = vmatpush3.bf16.msra.mxu1 %v454_v9 }
  0xe9   :  { %441 = vmatmul.mubr.msk.f32.vlgmr.msra.gmra.mrb[2].mxu1 %vm44_vm1, %v28_v16 }
 0x1b4   :  { %v194_v18 = vpop.f32.mrb[0].mxu1 }
 0x1b5   :  { %v195_v19 = vadd.f32 %v393_v17, %v194_v18  ;;  %v431_v20 = vpop.f32.mrb[1].mxu1 }
 0x1b7   :  { %472 = vtanh.f32 %v195_v19 }
 0x1bc   :  { %v279_v21 = vpop.f32.mrb[2].mxu1 }
 0x1bd   :  { %v280_v22 = vadd.f32 %v391_v12, %v279_v21  ;;  %v442_v23 = vpop.f32.mrb[3].mxu1 }
 0x1bf   :  { %448 = vmatmul.mubr.msk.f32.vlgmr.msra.gmra.mrb[2].mxu0 %vm124_vm2, %v280_v22 }
 0x1c1   :  { %v473_v25 = vpop.eup %472 }
 0x1c2   :  { %v205_v26 = vmul.f32 %v473_v25, %v395_v24 }
 0x1c4   :  { %v207_v27 = vsel %vm206_vm3, %v205_v26, 0.0 }
 0x1c5   :  { %208 = vadd.xlane.f32.xlu0 %v207_v27 }
 0x252   :  { %v209_v34 = vpop.xlane.xlu0 %208 }
 0x292   :  { %v352_v28 = vpop.f32.mrb[2].mxu0 }
 0x293   :  { %v353_v29 = vadd.f32 %v393_v17, %v352_v28  ;;  %v449_v30 = vpop.f32.mrb[3].mxu0 }
 0x295   :  { %474 = vtanh.f32 %v353_v29 }
 0x29f   :  { %v475_v31 = vpop.eup %474 }
 0x2a0   :  { %v357_v32 = vmul.f32 %v475_v31, %v395_v24 }
 0x2a2   :  { %v358_v33 = vsel %vm206_vm3, %v357_v32, 0.0 }
 0x2a3   :  { %359 = vadd.xlane.f32.xlu0 %v358_v33 }
 0x330   :  { %v360_v35 = vpop.xlane.xlu0 %359 }
 0x331   :  { %v361_v36 = vmax.f32 %v209_v34, %v360_v35 }
 0x333   :  { %v362_v37 = vsub.f32 %v209_v34, %v361_v36  ;;  %v365_v38 = vsub.f32 %v360_v35, %v361_v36 }
 0x335   :  { %v363_v39 = vmul.f32 1.442695, %v362_v37  ;;  %v366_v40 = vmul.f32 1.442695, %v365_v38 }
 0x337   :  { %476 = vpow2.f32 %v363_v39 }
 0x338   :  { %478 = vpow2.f32 %v366_v40 }
 0x341   :  { %v477_v41 = vpop.eup %476 }
 0x342   :  { %v479_v42 = vpop.eup %478 }
 0x343   :  { %v368_v43 = vadd.f32 %v479_v42, %v477_v41 }
 0x345   :  { %480 = vrcp.f32 %v368_v43 }
 0x34f   :  { %v481_v44 = vpop.eup %480 }
 0x350   :  { %v371_v45 = vmul.f32 %v481_v44, %v477_v41  ;;  %v373_v46 = vmul.f32 %v481_v44, %v479_v42 }
 0x352   :  { %v372_v47 = vmul.f32 %v371_v45, %v27_v11  ;;  %v374_v48 = vmul.f32 %v373_v46, %v28_v16 }
 0x354   :  { %v375_v49 = vadd.f32 %v374_v48, %v372_v47 }
 0x356   :  { %376 = vst.msk [vmem:[#allocation2] sm:$0xff] %vm44_vm1, %v375_v49 }
 0x357   :  { %493 = shalt.err (!%p490_p4)
}
 0x358   :  { %s494_s21 = scalar_lea.hbm %s611_s7, 128 }
 0x359   :  { %p495_p5 = scmp.ne.s32.totalorder %s611_s7, %s494_s21  ;;  %p498_p6 = scmp.lt.u32.totalorder %s494_s21, %s611_s7 }
 0x35b   :  { %p500_p7 = pnand %p498_p6, %p495_p5 }
 0x35d   :  { %503 = shalt.err (!%p500_p7)
}
 0x35e   :  { %386 = dma.vmem_to_hbm [thread:$0]  %s384_s5, 128, %s611_s7, [#allocation3]  }
 0x35f   :  { %504 = dma.done.wait [#allocation3], 128  }
 0x360   :  { %505 = vsyncadd [#allocation3], 4294967168 }
 0x361   :  { %390 = vsyncpa [#allocation3], 1 }

</bundles_post_ra>
